<compile_context>
chip_gen: v6e
topology: v6e:2x2x1
jax: 0.10.0
libtpu: 0.0.40
codegen_flags: <defaults>
</compile_context>

<pallas_src>
import functools
import math

import jax
import jax.numpy as jnp
from jax.experimental import pallas as pl
from jax.experimental.pallas import tpu as pltpu

_LANE = 128
# VMEM budget for the double-buffered tiles; conservative enough to fit v7x's
# 32 MiB scoped default as well as v5e/v6e.
_TILE_VMEM_BUDGET = 32 * 1024 * 1024
# Raised scoped-VMEM limit: above the 16/32 MiB defaults, below v7x's 64 MiB
# physical ceiling with headroom.
_VMEM_LIMIT_BYTES = 48 * 1024 * 1024


def _gaussian_noise_kernel(x_ref, n_ref, o_ref, *, sigma):
    # Compute in f32 and round exactly once into the output dtype.
    x = x_ref[...].astype(jnp.float32)
    n = n_ref[...].astype(jnp.float32)
    o_ref[...] = (x + jnp.float32(sigma) * n).astype(o_ref.dtype)


def _as_2d_lane_dense(x):
    """View x as a 2D (rows, cols) slab, preferring a 128-multiple lane width."""
    if x.ndim == 0:
        rows, cols = 1, 1
    else:
        rows = math.prod(x.shape[:-1])
        cols = x.shape[-1]
    if cols % _LANE != 0:
        total = x.size
        # Elementwise op: flatten to a lane-dense slab if possible so stores
        # are unmasked full-width `vst` instead of `vst.msk`.
        for w in (4096, 2048, 1024, 512, 256, 128):
            if total % w == 0:
                rows, cols = total // w, w
                break
        # else: keep (rows, cols); stores are lane-masked but still correct.
    return x.reshape(rows, cols), rows, cols


def _pick_block_rows(rows, cols, x_item, n_item, o_item):
    """Largest row tile s.t. 3 arrays x 2 pipeline buffers fit the VMEM budget."""
    packing = {1: 32, 2: 16, 4: 8}.get(x_item, 8)  # sublane packing per dtype
    bytes_per_row = 2 * cols * (x_item + n_item + o_item)  # x2: double-buffering
    block_rows = (_TILE_VMEM_BUDGET // max(bytes_per_row, 1)) // packing * packing
    block_rows = max(packing, block_rows)
    return min(block_rows, rows)


def gaussian_noise(x, *, sigma=0.0, seed=0, training=True, donate_x=False):
    """Pallas implementation of GaussianNoise.forward."""
    if (not training) or sigma == 0:
        # eval mode / sigma == 0 is the identity, exactly like the PyTorch module.
        return x

    orig_shape = x.shape
    x2d, rows, cols = _as_2d_lane_dense(x)

    noise_dtype = x.dtype if jnp.issubdtype(x.dtype, jnp.floating) else jnp.float32
    noise = jax.random.normal(jax.random.PRNGKey(seed), (rows, cols), dtype=noise_dtype)

    block_rows = _pick_block_rows(
        rows, cols, x2d.dtype.itemsize, noise.dtype.itemsize, x2d.dtype.itemsize
    )
    grid = (pl.cdiv(rows, block_rows),)
    spec = pl.BlockSpec((block_rows, cols), lambda i: (i, 0))

    kernel = functools.partial(_gaussian_noise_kernel, sigma=float(sigma))

    y2d = pl.pallas_call(
        kernel,
        out_shape=jax.ShapeDtypeStruct((rows, cols), x.dtype),
        grid=grid,
        in_specs=[spec, spec],
        out_specs=spec,
        input_output_aliases={0: 0} if donate_x else {},
        compiler_params=pltpu.CompilerParams(
            # Tiles are fully independent -> shard the grid across TCs on v7x.
            dimension_semantics=("parallel",),
            vmem_limit_bytes=_VMEM_LIMIT_BYTES,
        ),
    )(x2d, noise)
    return y2d.reshape(orig_shape)


if __name__ == "__main__":
    key = jax.random.PRNGKey(0)
    B, F = 8, 256  # small (batch, features) consistent with scAce dense inputs
    x = jax.random.normal(key, (B, F), dtype=jnp.float32)

    sigma, seed = 0.5, 1234

    # Training mode: x + sigma * noise.
    y_train = jax.block_until_ready(
        gaussian_noise(x, sigma=sigma, seed=seed, training=True)
    )
    assert y_train.shape == x.shape and y_train.dtype == x.dtype

    # Exact reference: the kernel adds sigma * N(0,1) drawn from PRNGKey(seed).
    expected = x + jnp.float32(sigma) * jax.random.normal(
        jax.random.PRNGKey(seed), (B, F), dtype=jnp.float32
    )
    assert jnp.allclose(y_train, expected, atol=1e-5, rtol=1e-5)

    delta = y_train - x
    assert float(jnp.max(jnp.abs(delta))) > 0.0
    assert abs(float(jnp.mean(delta))) < 0.2  # zero-mean-ish over 2048 samples

    # Eval mode: identity.
    y_eval = jax.block_until_ready(
        gaussian_noise(x, sigma=sigma, seed=seed, training=False)
    )
    assert bool(jnp.all(y_eval == x))

    print("KERNEL_OK")
</pallas_src>

<mosaic_0001>
module attributes {stable_mosaic.version = 11 : i64} {
  func.func @_gaussian_noise_kernel(%arg0: i32, %arg1: memref<8x256xf32, #tpu.memory_space<vmem>>, %arg2: memref<8x256xf32, #tpu.memory_space<vmem>>, %arg3: memref<8x256xf32, #tpu.memory_space<vmem>>) attributes {dimension_semantics = [#tpu.dimension_semantics<parallel>], iteration_bounds = array<i64: 1>, scalar_prefetch = 0 : i64, scratch_operands = 0 : i64, tpu.core_type = #tpu.core_type<tc>, window_params = [{transform_indices = @transform_0, window_bounds = array<i64: 8, 256>}, {transform_indices = @transform_1, window_bounds = array<i64: 8, 256>}, {transform_indices = @transform_2, window_bounds = array<i64: 8, 256>}]} {
    %c0 = arith.constant 0 : index
    %c0_0 = arith.constant 0 : index
    %0 = vector.load %arg1[%c0, %c0_0] : memref<8x256xf32, #tpu.memory_space<vmem>>, vector<8x256xf32>
    %c0_1 = arith.constant 0 : index
    %c0_2 = arith.constant 0 : index
    %1 = vector.load %arg2[%c0_1, %c0_2] : memref<8x256xf32, #tpu.memory_space<vmem>>, vector<8x256xf32>
    %cst = arith.constant 5.000000e-01 : f32
    %2 = vector.broadcast %cst : f32 to vector<8x256xf32>
    %3 = arith.mulf %2, %1 : vector<8x256xf32>
    %4 = arith.addf %0, %3 : vector<8x256xf32>
    %c0_3 = arith.constant 0 : index
    %c0_4 = arith.constant 0 : index
    %5 = vector.load %arg3[%c0_3, %c0_4] : memref<8x256xf32, #tpu.memory_space<vmem>>, vector<8x256xf32>
    tpu.vector_store %arg3[%c0_3, %c0_4], %4 {strides = array<i32>} : memref<8x256xf32, #tpu.memory_space<vmem>>, vector<8x256xf32>,
    return
  }
  func.func @transform_0(%arg0: i32) -> (i32, i32) {
    %c0_i32 = arith.constant 0 : i32
    %c0_i32_0 = arith.constant 0 : i32
    return %arg0, %c0_i32 : i32, i32
  }
  func.func @transform_1(%arg0: i32) -> (i32, i32) {
    %c0_i32 = arith.constant 0 : i32
    %c0_i32_0 = arith.constant 0 : i32
    return %arg0, %c0_i32 : i32, i32
  }
  func.func @transform_2(%arg0: i32) -> (i32, i32) {
    %c0_i32 = arith.constant 0 : i32
    %c0_i32_0 = arith.constant 0 : i32
    return %arg0, %c0_i32 : i32, i32
  }
}

</mosaic_0001>

<bundles_post_ra>
// kernel: tpu_custom_call.1
= control target key start
LH: loop header
LB: loop body
LE: loop exit
PB: predicated region body
PF: predicated region fallthrough
CT: control target
= control target key end

     0   :  { %7 = vsyncpa [#allocation3], 0  ;;  %s158_s0 = inlined_call_operand.hbm [shape: f32[8,256], index: 0, kind: input, shape index: {}]   ;;  %s159_s1 = inlined_call_operand.hbm [shape: f32[8,256], index: 1, kind: input, shape index: {}]   ;;  %s160_s2 = inlined_call_operand.hbm [shape: f32[8,256], index: 2, kind: output, shape index: {}]  }
   0x1   :  { %8 = vsyncpa [#allocation6], 0 }
   0x2   :  { %9 = vsyncpa [#allocation4], 0  ;;  %s131_s9 = smov [#allocation2]   ;;  %s132_s11 = smov [#allocation5]  }
   0x3   :  { %s16_s10 = sshll.u32 %s131_s9, 4  ;;  %s26_s12 = sshll.u32 %s132_s11, 4  ;;  %s17_s10 = int_to_ptr.vmem [resolvable:$true] %s16_s10  ;;  %s27_s12 = int_to_ptr.vmem [resolvable:$true] %s26_s12 }
   0x4   :  { %s73_s13 = scalar_lea.vmem %s17_s10, 256  ;;  %p78_p1 = scmp.lt.s32.totalorder %s17_s10, %s17_s10 }
   0x5   :  { %p74_p0 = scmp.ne.s32.totalorder %s17_s10, %s73_s13  ;;  %p79_p2 = scmp.lt.s32.totalorder %s73_s13, %s73_s13 }
   0x7   :  { %p80_p3 = por %p79_p2, %p78_p1 }
   0x9   :  { %p81_p4 = pnand %p80_p3, %p74_p0 }
   0xb   :  { %84 = shalt.err (!%p81_p4)
}
   0xc   :  { %19 = dma.hbm_to_vmem [thread:$0]  %s158_s0, 256, %s17_s10, [#allocation3]  }
   0xd   :  { %s93_s16 = scalar_lea.vmem %s27_s12, 256  ;;  %p98_p6 = scmp.lt.s32.totalorder %s27_s12, %s27_s12 }
   0xe   :  { %p94_p5 = scmp.ne.s32.totalorder %s27_s12, %s93_s16  ;;  %p99_p7 = scmp.lt.s32.totalorder %s93_s16, %s93_s16 }
  0x10   :  { %p100_p8 = por %p99_p7, %p98_p6 }
  0x12   :  { %p101_p9 = pnand %p100_p8, %p94_p5 }
  0x14   :  { %104 = shalt.err (!%p101_p9)
}
  0x15   :  { %29 = dma.hbm_to_vmem [thread:$0]  %s159_s1, 256, %s27_s12, [#allocation6]  }
  0x16   :  { %125 = dma.done.wait [#allocation3], 256  }
  0x17   :  { %126 = vsyncadd [#allocation3], 4294967040 }
  0x18   :  { %127 = dma.done.wait [#allocation6], 256  }
  0x19   :  { %128 = vsyncadd [#allocation6], 4294967040  ;;  %v36_v0 = vld [vmem:[#allocation2] sm:$0xff]  ;;  %v38_v1 = vld [vmem:[#allocation5] sm:$0xff]  ;;  %s133_s0 = smov [#allocation7]  }
  0x1a   :  { %v40_v2 = vmul.f32 0.5, %v38_v1  ;;  %v37_v3 = vld [vmem:[#allocation2 + $0x8] sm:$0xff]  ;;  %v39_v4 = vld [vmem:[#allocation5 + $0x8] sm:$0xff]  ;;  %s52_s19 = sshll.u32 %s133_s0, 4  ;;  %s53_s19 = int_to_ptr.vmem [resolvable:$true] %s52_s19 }
  0x1b   :  { %v41_v5 = vmul.f32 0.5, %v39_v4  ;;  %s105_s20 = scalar_lea.vmem %s53_s19, 256  ;;  %p110_p11 = scmp.lt.s32.totalorder %s53_s19, %s53_s19 }
  0x1c   :  { %v42_v6 = vadd.f32 %v40_v2, %v36_v0  ;;  %p106_p10 = scmp.ne.s32.totalorder %s53_s19, %s105_s20  ;;  %p111_p12 = scmp.lt.s32.totalorder %s105_s20, %s105_s20 }
  0x1d   :  { %v43_v7 = vadd.f32 %v41_v5, %v37_v3 }
  0x1e   :  { %44 = vst [vmem:[#allocation7] sm:$0xff] %v42_v6  ;;  %p112_p13 = por %p111_p12, %p110_p11 }
  0x1f   :  { %45 = vst [vmem:[#allocation7 + $0x8] sm:$0xff] %v43_v7 }
  0x20   :  { %p113_p0 = pnand %p112_p13, %p106_p10 }
  0x22   :  { %116 = shalt.err (!%p113_p0)
}
  0x23   :  { %55 = dma.vmem_to_hbm [thread:$0]  %s53_s19, 256, %s160_s2, [#allocation4]  }
  0x24   :  { %129 = dma.done.wait [#allocation4], 256  }
  0x25   :  { %130 = vsyncadd [#allocation4], 4294967040 }
  0x26   :  { %59 = vsyncpa [#allocation3], 1 }
  0x27   :  { %60 = vsyncpa [#allocation6], 1 }
  0x28   :  { %61 = vsyncpa [#allocation4], 1 }

</bundles_post_ra>
